<compile_context>
chip_gen: v6e
topology: v6e:2x2x1
jax: 0.10.0
libtpu: 0.0.40
codegen_flags: <defaults>
</compile_context>

<pallas_src>
import functools

import jax
import jax.numpy as jnp
from jax.experimental import pallas as pl
from jax.experimental.pallas import tpu as pltpu


def _cross_attn_kernel(q_ref, kv_ref, mask_ref, wq_ref, wkv_ref, wo_ref,
                       o_ref,
                       qh_sc, m_sc, l_sc, acc_sc,
                       *, num_heads, head_dim):
    D = num_heads * head_dim
    kv_step = pl.program_id(2)

    @pl.when(kv_step == 0)
    def _init():
        # Q projection (scale already folded into Wq by the wrapper); computed
        # once per (batch, q-tile) and cached in VMEM across the kv stream.
        qp = jnp.dot(q_ref[0], wq_ref[...],
                     preferred_element_type=jnp.float32)             # (TQ, D) f32
        tq = qp.shape[0]
        qh_sc[...] = jnp.transpose(
            qp.reshape(tq, num_heads, head_dim), (1, 0, 2)
        ).astype(jnp.bfloat16)                                        # (H, TQ, hd)
        m_sc[...] = jnp.full(m_sc.shape, -jnp.inf, dtype=m_sc.dtype)
        l_sc[...] = jnp.zeros(l_sc.shape, dtype=l_sc.dtype)
        acc_sc[...] = jnp.zeros(acc_sc.shape, dtype=acc_sc.dtype)

    # Fused K|V projection of this kv tile: one MXU pass with N = 2*D.
    kvp = jnp.dot(kv_ref[0], wkv_ref[...],
                  preferred_element_type=jnp.float32)                 # (TKV, 2D)
    tkv = kvp.shape[0]
    kh = jnp.transpose(
        kvp[:, :D].reshape(tkv, num_heads, head_dim), (1, 0, 2)
    ).astype(jnp.bfloat16)                                            # (H, TKV, hd)
    vh = jnp.transpose(
        kvp[:, D:].reshape(tkv, num_heads, head_dim), (1, 0, 2)
    ).astype(jnp.bfloat16)                                            # (H, TKV, hd)

    mask = mask_ref[0].astype(jnp.float32)                            # (TQ, TKV)

    # Scores for all heads in one batched contraction; K^T is folded into the
    # dot_general contraction (no materialized lane transpose).
    s = jnp.einsum("hqd,hkd->hqk", qh_sc[...], kh,
                   preferred_element_type=jnp.float32)                # (H, TQ, TKV)
    s = s + mask[None, :, :]

    # Online (flash-style) softmax update across the kv stream.
    m_prev = m_sc[...]
    m_new = jnp.maximum(m_prev, jnp.max(s, axis=-1, keepdims=True))
    alpha = jnp.exp(m_prev - m_new)
    p = jnp.exp(s - m_new)
    l_sc[...] = alpha * l_sc[...] + jnp.sum(p, axis=-1, keepdims=True)
    acc_sc[...] = alpha * acc_sc[...] + jnp.einsum(
        "hqk,hkd->hqd", p.astype(jnp.bfloat16), vh,
        preferred_element_type=jnp.float32)                           # (H, TQ, hd)
    m_sc[...] = m_new

    @pl.when(kv_step == pl.num_programs(2) - 1)
    def _finalize():
        inv_l = pl.reciprocal(l_sc[...], approx=True)                 # EUP slot
        ctx = acc_sc[...] * inv_l                                     # (H, TQ, hd)
        tq = ctx.shape[1]
        merged = jnp.transpose(ctx, (1, 0, 2)).reshape(tq, D)         # (TQ, D)
        out = jnp.dot(merged.astype(jnp.bfloat16), wo_ref[...],
                      preferred_element_type=jnp.float32)
        o_ref[0] = out.astype(o_ref.dtype)


def _pick_q_block(sq):
    if sq <= 256:
        return sq
    for c in (256, 128, 64, 32, 16, 8):
        if sq % c == 0:
            return c
    return sq


def _pick_kv_block(skv):
    if skv <= 512:
        return skv
    for c in (512, 384, 256, 128):   # multiples of 128 -> lane-aligned mask tiles
        if skv % c == 0:
            return c
    return skv                        # fall back: no kv streaming


def cross_attention_from_self(q, kv, mask, wq, wk, wv, wo, *,
                              num_heads, head_dim,
                              q_block=None, kv_block=None,
                              vmem_limit_bytes=48 * 1024 * 1024):
    """q: (B, Sq, D), kv: (B, Skv, D), mask: (B, Sq, Skv) additive,
    w*: (in_features, out_features) pre-transposed so the kernel does x @ W."""
    B, Sq, D = q.shape
    Skv = kv.shape[1]
    assert D == num_heads * head_dim
    scale = float(head_dim) ** (-0.5)

    tq = q_block if q_block is not None else _pick_q_block(Sq)
    tkv = kv_block if kv_block is not None else _pick_kv_block(Skv)
    assert Sq % tq == 0 and Skv % tkv == 0

    # bf16 operands feed the MXU at full rate and halve weight/activation/mask
    # DMA + VMEM bytes; accumulation stays f32 inside the kernel.
    q_b = q.astype(jnp.bfloat16)
    kv_b = kv.astype(jnp.bfloat16)
    mask_b = mask.astype(jnp.bfloat16)                  # upcast to f32 in-kernel
    wq_b = (wq * scale).astype(jnp.bfloat16)            # fold 1/sqrt(hd) into Wq
    wkv_b = jnp.concatenate([wk, wv], axis=1).astype(jnp.bfloat16)   # (D, 2D)
    wo_b = wo.astype(jnp.bfloat16)

    kernel = functools.partial(_cross_attn_kernel,
                               num_heads=num_heads, head_dim=head_dim)

    grid = (B, Sq // tq, Skv // tkv)
    return pl.pallas_call(
        kernel,
        out_shape=jax.ShapeDtypeStruct((B, Sq, D), q.dtype),
        grid_spec=pltpu.PrefetchScalarGridSpec(
            num_scalar_prefetch=0,
            grid=grid,
            in_specs=[
                pl.BlockSpec((1, tq, D),   lambda b, i, k: (b, i, 0)),   # q
                pl.BlockSpec((1, tkv, D),  lambda b, i, k: (b, k, 0)),   # kv
                pl.BlockSpec((1, tq, tkv), lambda b, i, k: (b, i, k)),   # mask
                pl.BlockSpec((D, D),       lambda b, i, k: (0, 0)),      # Wq*scale
                pl.BlockSpec((D, 2 * D),   lambda b, i, k: (0, 0)),      # Wk|Wv
                pl.BlockSpec((D, D),       lambda b, i, k: (0, 0)),      # Wo
            ],
            out_specs=pl.BlockSpec((1, tq, D), lambda b, i, k: (b, i, 0)),
            scratch_shapes=[
                pltpu.VMEM((num_heads, tq, head_dim), jnp.bfloat16),  # cached qh
                pltpu.VMEM((num_heads, tq, 1), jnp.float32),          # running max
                pltpu.VMEM((num_heads, tq, 1), jnp.float32),          # running sum
                pltpu.VMEM((num_heads, tq, head_dim), jnp.float32),   # accumulator
            ],
        ),
        compiler_params=pltpu.CompilerParams(
            dimension_semantics=("parallel", "parallel", "arbitrary"),
            vmem_limit_bytes=vmem_limit_bytes,
        ),
    )(q_b, kv_b, mask_b, wq_b, wkv_b, wo_b)


def _reference(q, kv, mask, wq, wk, wv, wo, *, num_heads, head_dim):
    B, Sq, D = q.shape
    scale = float(head_dim) ** (-0.5)

    def split_heads(x):
        return x.reshape(x.shape[0], x.shape[1], num_heads, head_dim).transpose(0, 2, 1, 3)

    qh = split_heads(q @ wq)
    kh = split_heads(kv @ wk)
    vh = split_heads(kv @ wv)
    attn = jnp.einsum("bhqd,bhkd->bhqk", qh, kh) * scale + mask[:, None, :, :]
    attn = jax.nn.softmax(attn, axis=-1)
    out = jnp.einsum("bhqk,bhkd->bhqd", attn, vh)
    out = out.transpose(0, 2, 1, 3).reshape(B, Sq, num_heads * head_dim)
    return out @ wo


if __name__ == "__main__":
    # Small shapes consistent with the module: hidden = num_heads * head_dim.
    B, Sq, Skv = 2, 8, 8
    num_heads, head_dim = 4, 8
    D = num_heads * head_dim  # 32

    key = jax.random.PRNGKey(0)
    k_q, k_kv, k_wq, k_wk, k_wv, k_wo, k_m = jax.random.split(key, 7)

    q = jax.random.normal(k_q, (B, Sq, D), dtype=jnp.float32)
    kv = jax.random.normal(k_kv, (B, Skv, D), dtype=jnp.float32)

    # Bias-free nn.Linear weights, stored transposed as (in, out).
    scale_init = 0.05
    wq = scale_init * jax.random.normal(k_wq, (D, D), dtype=jnp.float32)
    wk = scale_init * jax.random.normal(k_wk, (D, D), dtype=jnp.float32)
    wv = scale_init * jax.random.normal(k_wv, (D, D), dtype=jnp.float32)
    wo = scale_init * jax.random.normal(k_wo, (D, D), dtype=jnp.float32)

    # Additive attention mask (e.g. padding mask), shape (B, Sq, Skv).
    mask = jnp.where(jax.random.uniform(k_m, (B, Sq, Skv)) > 0.2,
                     0.0, -1e9).astype(jnp.float32)

    out = cross_attention_from_self(q, kv, mask, wq, wk, wv, wo,
                                    num_heads=num_heads, head_dim=head_dim)
    out = jax.block_until_ready(out)

    ref = _reference(q, kv, mask, wq, wk, wv, wo,
                     num_heads=num_heads, head_dim=head_dim)
    assert out.shape == (B, Sq, D)
    # bf16 MXU operands (f32 accumulation) vs an all-f32 reference.
    assert jnp.allclose(out, ref, atol=2e-2, rtol=2e-2), (
        "mismatch vs reference, max abs err = %s" % jnp.max(jnp.abs(out - ref)))

    print("KERNEL_OK")
</pallas_src>

<mosaic_0001>
module attributes {stable_mosaic.version = 11 : i64} {
  func.func @_cross_attn_kernel(%arg0: i32, %arg1: i32, %arg2: i32, %arg3: memref<1x8x32xbf16, #tpu.memory_space<vmem>>, %arg4: memref<1x8x32xbf16, #tpu.memory_space<vmem>>, %arg5: memref<1x8x8xbf16, #tpu.memory_space<vmem>>, %arg6: memref<32x32xbf16, #tpu.memory_space<vmem>>, %arg7: memref<32x64xbf16, #tpu.memory_space<vmem>>, %arg8: memref<32x32xbf16, #tpu.memory_space<vmem>>, %arg9: memref<1x8x32xf32, #tpu.memory_space<vmem>>, %arg10: memref<4x8x8xbf16, #tpu.memory_space<vmem>>, %arg11: memref<4x8x1xf32, #tpu.memory_space<vmem>>, %arg12: memref<4x8x1xf32, #tpu.memory_space<vmem>>, %arg13: memref<4x8x8xf32, #tpu.memory_space<vmem>>) attributes {dimension_semantics = [#tpu.dimension_semantics<parallel>, #tpu.dimension_semantics<parallel>, #tpu.dimension_semantics<arbitrary>], iteration_bounds = array<i64: 2, 1, 1>, scalar_prefetch = 0 : i64, scratch_operands = 4 : i64, tpu.core_type = #tpu.core_type<tc>, window_params = [{transform_indices = @transform_0, window_bounds = array<i64: 1, 8, 32>}, {transform_indices = @transform_1, window_bounds = array<i64: 1, 8, 32>}, {transform_indices = @transform_2, window_bounds = array<i64: 1, 8, 8>}, {pipeline_mode = #tpu.pipeline_mode<synchronous>, transform_indices = @transform_3, window_bounds = array<i64: 32, 32>}, {pipeline_mode = #tpu.pipeline_mode<synchronous>, transform_indices = @transform_4, window_bounds = array<i64: 32, 64>}, {pipeline_mode = #tpu.pipeline_mode<synchronous>, transform_indices = @transform_5, window_bounds = array<i64: 32, 32>}, {transform_indices = @transform_6, window_bounds = array<i64: 1, 8, 32>}]} {
    %c0_i32 = arith.constant 0 : i32
    %0 = arith.cmpi eq, %arg2, %c0_i32 : i32
    %1 = arith.extui %0 : i1 to i32
    %c0_i32_0 = arith.constant 0 : i32
    %2 = arith.cmpi ne, %1, %c0_i32_0 : i32
    scf.if %2 {
      %c0_35 = arith.constant 0 : index
      %c0_36 = arith.constant 0 : index
      %c0_37 = arith.constant 0 : index
      %49 = vector.load %arg3[%c0_35, %c0_36, %c0_37] : memref<1x8x32xbf16, #tpu.memory_space<vmem>>, vector<1x8x32xbf16>
      %50 = vector.shape_cast %49 : vector<1x8x32xbf16> to vector<8x32xbf16>
      %c0_38 = arith.constant 0 : index
      %c0_39 = arith.constant 0 : index
      %51 = vector.load %arg6[%c0_38, %c0_39] : memref<32x32xbf16, #tpu.memory_space<vmem>>, vector<32x32xbf16>
      %cst_40 = arith.constant dense<0.000000e+00> : vector<8x32xf32>
      %52 = tpu.matmul %50, %51, %cst_40 {dimension_numbers = #tpu.dot_dimension_numbers<[1], [0], [0], [1], [0, 0, 1, 1], [], []>} : vector<8x32xbf16>, vector<32x32xbf16>, vector<8x32xf32> -> vector<8x32xf32>
      %53 = vector.shape_cast %52 : vector<8x32xf32> to vector<8x4x8xf32>
      %54 = tpu.transpose %53, [1, 0, 2] : vector<8x4x8xf32> -> vector<4x8x8xf32>
      %55 = arith.truncf %54 : vector<4x8x8xf32> to vector<4x8x8xbf16>
      %c0_41 = arith.constant 0 : index
      %c0_42 = arith.constant 0 : index
      %c0_43 = arith.constant 0 : index
      %56 = vector.load %arg10[%c0_41, %c0_42, %c0_43] : memref<4x8x8xbf16, #tpu.memory_space<vmem>>, vector<4x8x8xbf16>
      tpu.vector_store %arg10[%c0_41, %c0_42, %c0_43], %55 {strides = array<i32>} : memref<4x8x8xbf16, #tpu.memory_space<vmem>>, vector<4x8x8xbf16>,
      %cst_44 = arith.constant 0xFF800000 : f32
      %57 = vector.broadcast %cst_44 : f32 to vector<4x8x1xf32>
      %c0_45 = arith.constant 0 : index
      %c0_46 = arith.constant 0 : index
      %c0_47 = arith.constant 0 : index
      %58 = vector.load %arg11[%c0_45, %c0_46, %c0_47] : memref<4x8x1xf32, #tpu.memory_space<vmem>>, vector<4x8x1xf32>
      tpu.vector_store %arg11[%c0_45, %c0_46, %c0_47], %57 {strides = array<i32>} : memref<4x8x1xf32, #tpu.memory_space<vmem>>, vector<4x8x1xf32>,
      %cst_48 = arith.constant 0.000000e+00 : f32
      %59 = vector.broadcast %cst_48 : f32 to vector<4x8x1xf32>
      %c0_49 = arith.constant 0 : index
      %c0_50 = arith.constant 0 : index
      %c0_51 = arith.constant 0 : index
      %60 = vector.load %arg12[%c0_49, %c0_50, %c0_51] : memref<4x8x1xf32, #tpu.memory_space<vmem>>, vector<4x8x1xf32>
      tpu.vector_store %arg12[%c0_49, %c0_50, %c0_51], %59 {strides = array<i32>} : memref<4x8x1xf32, #tpu.memory_space<vmem>>, vector<4x8x1xf32>,
      %cst_52 = arith.constant 0.000000e+00 : f32
      %61 = vector.broadcast %cst_52 : f32 to vector<4x8x8xf32>
      %c0_53 = arith.constant 0 : index
      %c0_54 = arith.constant 0 : index
      %c0_55 = arith.constant 0 : index
      %62 = vector.load %arg13[%c0_53, %c0_54, %c0_55] : memref<4x8x8xf32, #tpu.memory_space<vmem>>, vector<4x8x8xf32>
      tpu.vector_store %arg13[%c0_53, %c0_54, %c0_55], %61 {strides = array<i32>} : memref<4x8x8xf32, #tpu.memory_space<vmem>>, vector<4x8x8xf32>,
    } else {
    }
    %c0 = arith.constant 0 : index
    %c0_1 = arith.constant 0 : index
    %c0_2 = arith.constant 0 : index
    %3 = vector.load %arg4[%c0, %c0_1, %c0_2] : memref<1x8x32xbf16, #tpu.memory_space<vmem>>, vector<1x8x32xbf16>
    %4 = vector.shape_cast %3 : vector<1x8x32xbf16> to vector<8x32xbf16>
    %c0_3 = arith.constant 0 : index
    %c0_4 = arith.constant 0 : index
    %5 = vector.load %arg7[%c0_3, %c0_4] : memref<32x64xbf16, #tpu.memory_space<vmem>>, vector<32x64xbf16>
    %cst = arith.constant dense<0.000000e+00> : vector<8x64xf32>
    %6 = tpu.matmul %4, %5, %cst {dimension_numbers = #tpu.dot_dimension_numbers<[1], [0], [0], [1], [0, 0, 1, 1], [], []>} : vector<8x32xbf16>, vector<32x64xbf16>, vector<8x64xf32> -> vector<8x64xf32>
    %7 = vector.extract_strided_slice %6 {offsets = [0, 0], sizes = [8, 32], strides = [1, 1]} : vector<8x64xf32> to vector<8x32xf32>
    %8 = vector.shape_cast %7 : vector<8x32xf32> to vector<8x4x8xf32>
    %9 = tpu.transpose %8, [1, 0, 2] : vector<8x4x8xf32> -> vector<4x8x8xf32>
    %10 = arith.truncf %9 : vector<4x8x8xf32> to vector<4x8x8xbf16>
    %11 = vector.extract_strided_slice %6 {offsets = [0, 32], sizes = [8, 32], strides = [1, 1]} : vector<8x64xf32> to vector<8x32xf32>
    %12 = vector.shape_cast %11 : vector<8x32xf32> to vector<8x4x8xf32>
    %13 = tpu.transpose %12, [1, 0, 2] : vector<8x4x8xf32> -> vector<4x8x8xf32>
    %14 = arith.truncf %13 : vector<4x8x8xf32> to vector<4x8x8xbf16>
    %c0_5 = arith.constant 0 : index
    %c0_6 = arith.constant 0 : index
    %c0_7 = arith.constant 0 : index
    %15 = vector.load %arg5[%c0_5, %c0_6, %c0_7] : memref<1x8x8xbf16, #tpu.memory_space<vmem>>, vector<1x8x8xbf16>
    %16 = vector.shape_cast %15 : vector<1x8x8xbf16> to vector<8x8xbf16>
    %17 = arith.extf %16 : vector<8x8xbf16> to vector<8x8xf32>
    %c0_8 = arith.constant 0 : index
    %c0_9 = arith.constant 0 : index
    %c0_10 = arith.constant 0 : index
    %18 = vector.load %arg10[%c0_8, %c0_9, %c0_10] : memref<4x8x8xbf16, #tpu.memory_space<vmem>>, vector<4x8x8xbf16>
    "tpu.trace_start"() <{level = 10 : i32, message = "hqd,hkd->hqk"}> : () -> ()
    %cst_11 = arith.constant dense<0.000000e+00> : vector<4x8x8xf32>
    %19 = tpu.matmul %18, %10, %cst_11 {dimension_numbers = #tpu.dot_dimension_numbers<[2], [2], [1], [1], [0, 0, 0, 1, 1, 1], [0], [0]>} : vector<4x8x8xbf16>, vector<4x8x8xbf16>, vector<4x8x8xf32> -> vector<4x8x8xf32>
    "tpu.trace_stop"() : () -> ()
    %20 = vector.shape_cast %17 : vector<8x8xf32> to vector<1x8x8xf32>
    %21 = vector.broadcast %20 : vector<1x8x8xf32> to vector<4x8x8xf32>
    %22 = arith.addf %19, %21 : vector<4x8x8xf32>
    %c0_12 = arith.constant 0 : index
    %c0_13 = arith.constant 0 : index
    %c0_14 = arith.constant 0 : index
    %23 = vector.load %arg11[%c0_12, %c0_13, %c0_14] : memref<4x8x1xf32, #tpu.memory_space<vmem>>, vector<4x8x1xf32>
    %cst_15 = arith.constant dense<0xFF800000> : vector<4x8xf32>
    %24 = vector.multi_reduction <maximumf>, %22, %cst_15 [2] : vector<4x8x8xf32> to vector<4x8xf32>
    %25 = vector.shape_cast %24 : vector<4x8xf32> to vector<4x8x1xf32>
    %26 = arith.maximumf %23, %25 : vector<4x8x1xf32>
    %27 = arith.subf %23, %26 : vector<4x8x1xf32>
    %28 = math.exp %27 : vector<4x8x1xf32>
    %29 = vector.broadcast %26 : vector<4x8x1xf32> to vector<4x8x8xf32>
    %30 = arith.subf %22, %29 : vector<4x8x8xf32>
    %31 = math.exp %30 : vector<4x8x8xf32>
    %c0_16 = arith.constant 0 : index
    %c0_17 = arith.constant 0 : index
    %c0_18 = arith.constant 0 : index
    %32 = vector.load %arg12[%c0_16, %c0_17, %c0_18] : memref<4x8x1xf32, #tpu.memory_space<vmem>>, vector<4x8x1xf32>
    %33 = arith.mulf %28, %32 : vector<4x8x1xf32>
    %cst_19 = arith.constant dense<0.000000e+00> : vector<4x8xf32>
    %34 = vector.multi_reduction <add>, %31, %cst_19 [2] : vector<4x8x8xf32> to vector<4x8xf32>
    %35 = vector.shape_cast %34 : vector<4x8xf32> to vector<4x8x1xf32>
    %36 = arith.addf %33, %35 : vector<4x8x1xf32>
    %c0_20 = arith.constant 0 : index
    %c0_21 = arith.constant 0 : index
    %c0_22 = arith.constant 0 : index
    %37 = vector.load %arg12[%c0_20, %c0_21, %c0_22] : memref<4x8x1xf32, #tpu.memory_space<vmem>>, vector<4x8x1xf32>
    tpu.vector_store %arg12[%c0_20, %c0_21, %c0_22], %36 {strides = array<i32>} : memref<4x8x1xf32, #tpu.memory_space<vmem>>, vector<4x8x1xf32>,
    %c0_23 = arith.constant 0 : index
    %c0_24 = arith.constant 0 : index
    %c0_25 = arith.constant 0 : index
    %38 = vector.load %arg13[%c0_23, %c0_24, %c0_25] : memref<4x8x8xf32, #tpu.memory_space<vmem>>, vector<4x8x8xf32>
    %39 = vector.broadcast %28 : vector<4x8x1xf32> to vector<4x8x8xf32>
    %40 = arith.mulf %39, %38 : vector<4x8x8xf32>
    %41 = arith.truncf %31 : vector<4x8x8xf32> to vector<4x8x8xbf16>
    "tpu.trace_start"() <{level = 10 : i32, message = "hqk,hkd->hqd"}> : () -> ()
    %cst_26 = arith.constant dense<0.000000e+00> : vector<4x8x8xf32>
    %42 = tpu.matmul %41, %14, %cst_26 {dimension_numbers = #tpu.dot_dimension_numbers<[2], [1], [1], [2], [0, 0, 0, 1, 1, 2], [0], [0]>} : vector<4x8x8xbf16>, vector<4x8x8xbf16>, vector<4x8x8xf32> -> vector<4x8x8xf32>
    "tpu.trace_stop"() : () -> ()
    %43 = arith.addf %40, %42 : vector<4x8x8xf32>
    %c0_27 = arith.constant 0 : index
    %c0_28 = arith.constant 0 : index
    %c0_29 = arith.constant 0 : index
    %44 = vector.load %arg13[%c0_27, %c0_28, %c0_29] : memref<4x8x8xf32, #tpu.memory_space<vmem>>, vector<4x8x8xf32>
    tpu.vector_store %arg13[%c0_27, %c0_28, %c0_29], %43 {strides = array<i32>} : memref<4x8x8xf32, #tpu.memory_space<vmem>>, vector<4x8x8xf32>,
    %c0_30 = arith.constant 0 : index
    %c0_31 = arith.constant 0 : index
    %c0_32 = arith.constant 0 : index
    %45 = vector.load %arg11[%c0_30, %c0_31, %c0_32] : memref<4x8x1xf32, #tpu.memory_space<vmem>>, vector<4x8x1xf32>
    tpu.vector_store %arg11[%c0_30, %c0_31, %c0_32], %26 {strides = array<i32>} : memref<4x8x1xf32, #tpu.memory_space<vmem>>, vector<4x8x1xf32>,
    %c0_i32_33 = arith.constant 0 : i32
    %46 = arith.cmpi eq, %arg2, %c0_i32_33 : i32
    %47 = arith.extui %46 : i1 to i32
    %c0_i32_34 = arith.constant 0 : i32
    %48 = arith.cmpi ne, %47, %c0_i32_34 : i32
    scf.if %48 {
      %c0_35 = arith.constant 0 : index
      %c0_36 = arith.constant 0 : index
      %c0_37 = arith.constant 0 : index
      %49 = vector.load %arg12[%c0_35, %c0_36, %c0_37] : memref<4x8x1xf32, #tpu.memory_space<vmem>>, vector<4x8x1xf32>
      %50 = tpu.reciprocal %49 {approx = true} : vector<4x8x1xf32> -> vector<4x8x1xf32>
      %c0_38 = arith.constant 0 : index
      %c0_39 = arith.constant 0 : index
      %c0_40 = arith.constant 0 : index
      %51 = vector.load %arg13[%c0_38, %c0_39, %c0_40] : memref<4x8x8xf32, #tpu.memory_space<vmem>>, vector<4x8x8xf32>
      %52 = vector.broadcast %50 : vector<4x8x1xf32> to vector<4x8x8xf32>
      %53 = arith.mulf %51, %52 : vector<4x8x8xf32>
      %54 = tpu.transpose %53, [1, 0, 2] : vector<4x8x8xf32> -> vector<8x4x8xf32>
      %55 = vector.shape_cast %54 : vector<8x4x8xf32> to vector<8x32xf32>
      %56 = arith.truncf %55 : vector<8x32xf32> to vector<8x32xbf16>
      %c0_41 = arith.constant 0 : index
      %c0_42 = arith.constant 0 : index
      %57 = vector.load %arg8[%c0_41, %c0_42] : memref<32x32xbf16, #tpu.memory_space<vmem>>, vector<32x32xbf16>
      %cst_43 = arith.constant dense<0.000000e+00> : vector<8x32xf32>
      %58 = tpu.matmul %56, %57, %cst_43 {dimension_numbers = #tpu.dot_dimension_numbers<[1], [0], [0], [1], [0, 0, 1, 1], [], []>} : vector<8x32xbf16>, vector<32x32xbf16>, vector<8x32xf32> -> vector<8x32xf32>
      %c0_44 = arith.constant 0 : index
      %c0_45 = arith.constant 0 : index
      %c0_46 = arith.constant 0 : index
      %59 = vector.load %arg9[%c0_44, %c0_45, %c0_46] : memref<1x8x32xf32, #tpu.memory_space<vmem>>, vector<1x8x32xf32>
      %60 = vector.shape_cast %59 : vector<1x8x32xf32> to vector<8x32xf32>
      %61 = vector.shape_cast %58 : vector<8x32xf32> to vector<1x8x32xf32>
      tpu.vector_store %arg9[%c0_44, %c0_45, %c0_46], %61 {strides = array<i32>} : memref<1x8x32xf32, #tpu.memory_space<vmem>>, vector<1x8x32xf32>,
    } else {
    }
    return
  }
  func.func @transform_0(%arg0: i32, %arg1: i32, %arg2: i32) -> (i32, i32, i32) {
    %c0_i32 = arith.constant 0 : i32
    %c0_i32_0 = arith.constant 0 : i32
    return %arg0, %arg1, %c0_i32 : i32, i32, i32
  }
  func.func @transform_1(%arg0: i32, %arg1: i32, %arg2: i32) -> (i32, i32, i32) {
    %c0_i32 = arith.constant 0 : i32
    %c0_i32_0 = arith.constant 0 : i32
    return %arg0, %arg2, %c0_i32 : i32, i32, i32
  }
  func.func @transform_2(%arg0: i32, %arg1: i32, %arg2: i32) -> (i32, i32, i32) {
    %c0_i32 = arith.constant 0 : i32
    return %arg0, %arg1, %arg2 : i32, i32, i32
  }
  func.func @transform_3(%arg0: i32, %arg1: i32, %arg2: i32) -> (i32, i32) {
    %c0_i32 = arith.constant 0 : i32
    %c0_i32_0 = arith.constant 0 : i32
    %c0_i32_1 = arith.constant 0 : i32
    return %c0_i32, %c0_i32_0 : i32, i32
  }
  func.func @transform_4(%arg0: i32, %arg1: i32, %arg2: i32) -> (i32, i32) {
    %c0_i32 = arith.constant 0 : i32
    %c0_i32_0 = arith.constant 0 : i32
    %c0_i32_1 = arith.constant 0 : i32
    return %c0_i32, %c0_i32_0 : i32, i32
  }
  func.func @transform_5(%arg0: i32, %arg1: i32, %arg2: i32) -> (i32, i32) {
    %c0_i32 = arith.constant 0 : i32
    %c0_i32_0 = arith.constant 0 : i32
    %c0_i32_1 = arith.constant 0 : i32
    return %c0_i32, %c0_i32_0 : i32, i32
  }
  func.func @transform_6(%arg0: i32, %arg1: i32, %arg2: i32) -> (i32, i32, i32) {
    %c0_i32 = arith.constant 0 : i32
    %c0_i32_0 = arith.constant 0 : i32
    return %arg0, %arg1, %c0_i32 : i32, i32, i32
  }
}

</mosaic_0001>

<bundles_post_ra>
// kernel: tpu_custom_call.1
= control target key start
LH: loop header
LB: loop body
LE: loop exit
PB: predicated region body
PF: predicated region fallthrough
CT: control target
= control target key end

     0   :  { %s3072_s0 = inlined_call_operand.hbm [shape: bf16[2,8,32], index: 0, kind: input, shape index: {}]   ;;  %s3073_s1 = inlined_call_operand.hbm [shape: bf16[2,8,32], index: 1, kind: input, shape index: {}]   ;;  %s3074_s2 = inlined_call_operand.hbm [shape: bf16[2,8,8], index: 2, kind: input, shape index: {}]   ;;  %s3075_s3 = inlined_call_operand.hbm [shape: bf16[32,32], index: 3, kind: input, shape index: {}]   ;;  %s3076_s4 = inlined_call_operand.hbm [shape: bf16[32,64], index: 4, kind: input, shape index: {}]   ;;  %s3077_s5 = inlined_call_operand.hbm [shape: bf16[32,32], index: 5, kind: input, shape index: {}]   ;;  %s3078_s6 = inlined_call_operand.hbm [shape: f32[2,8,32], index: 6, kind: output, shape index: {}]  }
   0x1   :  { %3094 = sst [smem:[#allocation27_spill]] %s3073_s1 }
   0x2   :  { %3095 = sst [smem:[#allocation28_spill]] %s3075_s3 }
   0x3   :  { %3096 = sst [smem:[#allocation29_spill]] %s3076_s4 }
   0x4   :  { %11 = vsyncpa [#allocation7], 0 }
   0x5   :  { %13 = vsyncpa [#allocation7 + $0x1], 0 }
   0x6   :  { %14 = vsyncpa [#allocation10], 0 }
   0x7   :  { %16 = vsyncpa [#allocation10 + $0x1], 0 }
   0x8   :  { %17 = vsyncpa [#allocation13], 0 }
   0x9   :  { %18 = vsyncpa [#allocation16], 0 }
   0xa   :  { %19 = vsyncpa [#allocation8], 0 }
   0xb   :  { %21 = vsyncpa [#allocation8 + $0x1], 0  ;;  %s2562_s21 = smov 0   ;;  %s2564_s22 = smov 0  }
   0xc   :  { %s2566_s23 = smov 0   ;;  %s2568_s24 = smov 0  }
   0xd   :  { %s2570_s25 = smov 0   ;;  %s2572_s26 = smov 0  }
   0xe LB: > { %3097 = sst [smem:[#allocation23_spill]] %s2499_s25  ;;  %s2593_s27 = sadd.s32 4294967295, %s2503_s26   ;;  %s2503_s26 = sphi %s2572_s26, %s27_s26   ;;  %s2499_s25 = sphi %s2570_s25, %s3130_s25   ;;  %s2495_s24 = sphi %s2568_s24, %s3129_s24   ;;  %s2491_s23 = sphi %s2566_s23, %s3133_s23   ;;  %s2487_s22 = sphi %s2564_s22, %s3132_s22   ;;  %s2483_s21 = sphi %s2562_s21, %s3131_s21  }
   0xf   : > { %3098 = sst [smem:[#allocation24_spill]] %s2503_s26  ;;  %s1953_s28 = sadd.s32 4294967294, %s2503_s26  }
  0x10   : > { %p68_p0 = scmp.ne.s32.totalorder %s2487_s22, %s2483_s21  ;;  %p3088_p1 = scmp.eq.s32.totalorder %s2593_s27, 0 }
  0x11   : > { %p221_p3 = scmp.eq.s32.totalorder %s1953_s28, 1  ;;  %p1954_p5 = scmp.ge.s32.totalorder %s2503_s26, 1 }
  0x12   : > { %p2602_p4 = por %p3088_p1, %p68_p0  ;;  %p228_p7 = scmp.lt.s32.totalorder %s2503_s26, 3 }
  0x13   : > { %p2607_p6 = por %p221_p3, %p68_p0  ;;  %s2505_s8 = smov [#allocation12]  }
  0x14   : > { %s3099_s29 = scalar_select %p2602_p4, 1, 0 }
  0x15   : > { %s3100_s30 = scalar_select %p2607_p6, 1, 0 }
  0x16   : > { %p2612_p8 = pnand %p1954_p5, %p228_p7  ;;  %s240_s9 = sshll.u32 %s2505_s8, 4  ;;  %s241_s9 = int_to_ptr.vmem [resolvable:$true] %s240_s9 }
  0x17   : > { %s46_s11 = sadd.s32 1, %s2499_s25  ;;  %s2260_s12 = scalar_lea.vmem %s241_s9, 256 }
  0x18   : > { %s3101_s7 = scalar_select %p2612_p8, 1, 0 }
  0x19   : > { %p2119_p9 = pneg %p2612_p8  ;;  %p2261_p13 = scmp.ne.s32.totalorder %s241_s9, %s2260_s12 }
  0x1a   : > { %p2268_p5 = scmp.lt.s32.totalorder %s241_s9, %s241_s9  ;;  %p2269_p7 = scmp.lt.s32.totalorder %s2260_s12, %s2260_s12 }
  0x1b   : > { %p2621_p11 = pnand %p2119_p9, %p3088_p1 }
  0x1c   : > { %p2270_p2 = por %p2269_p7, %p2268_p5 }
  0x1d   : > { %p3089_p12 = pneg %p2621_p11 }
  0x1f   : > { %p2263_p0 = pnand %p2261_p13, %p3089_p12 }
  0x21   : > { %p2264_p3 = pneg %p2263_p0 }
  0x23   : > { %p2271_p10 = pnand %p2270_p2, %p2264_p3 }
  0x25   : > { %2274 = shalt.err (!%p2271_p10)
}
  0x26   : > { %s3079_s13 = smov 64   ;;  %s3081_s14 = smov 4  }
  0x27   : > { %s3103_s3 = sld [smem:[#allocation28_spill]]  ;;  %p48_p2 = scmp.ge.s32.totalorder %s46_s11, 2 }
  0x28   : > { %s55_s17 = sadd.s32 1, %s2491_s23  ;;  %p62_p9 = scmp.ne.s32.totalorder %s2491_s23, %s2487_s22 }
  0x29   : > { %p63_p10 = scmp.eq.s32.totalorder %s2503_s26, 0  ;;  %s3135_s11 = smov (%p48_p2, %s46_s11), 0 }
  0x2a   : > { %3104 = sst [smem:[#allocation25_spill]] %s3135_s11  ;;  %p3105_p0 = scmp.eq.s32.totalorder %s2593_s27, 1 }
  0x2b   : > { %p64_p13 = por %p63_p10, %p62_p9  ;;  %s50_s19 = ssub.s32 %s2499_s25, %s3135_s11 }
  0x2c   : > { %p2647_p3 = por %p3105_p0, %p62_p9  ;;  %p2146_p5 = scmp.lt.s32.totalorder %s2503_s26, 2 }
  0x2d   : > { %2122 = dma.hbm_to_vmem [thread:$0]  (!%p2621_p11), %s3103_s3, 256, %s241_s9, [#allocation13], %s3079_s13, %s3079_s13, %s3081_s14  }
  0x2e   : > { %s3106_s18 = scalar_select %p2647_p3, 1, 0 }
  0x2f   : > { %p53_p7 = scmp.eq.s32.totalorder %s50_s19, 0  ;;  %s3083_s20 = sand.u32 1, %s2491_s23  }
  0x30   : > { %s2657_s28 = sshll.u32 %s3083_s20, 2  ;;  %s2660_s8 = sshll.u32 %s2499_s25, 6 }
  0x31   : > { %s2663_s9 = scalar_select %p53_p7, %s2491_s23, %s55_s17  }
  0x32   : > { %p2665_p2 = pnand %p2146_p5, %p64_p13  ;;  %s299_s15 = sand.u32 1, %s2503_s26  }
  0x33   : > { %3107 = sst [smem:[#allocation26_spill]] %s2663_s9  ;;  %s303_s14 = scalar_lea.vmem [#allocation9], %s2657_s28 }
  0x34   : > { %s3109_s1 = sld [smem:[#allocation27_spill]]  ;;  %s311_s20 = sshll.u32 %s303_s14, 4  ;;  %s312_s20 = int_to_ptr.vmem [resolvable:$true] %s311_s20 }
  0x35   : > { %s2508_s3 = smov [#allocation14]   ;;  %s2675_s25 = scalar_lea.sflag [#allocation10], %s299_s15 }
  0x36   : > { %s253_s11 = sshll.u32 %s2508_s3, 4  ;;  %p3090_p9 = pneg %p2665_p2  ;;  %s254_s11 = int_to_ptr.vmem [resolvable:$true] %s253_s11 }
  0x37   : > { %s2288_s17 = scalar_lea.vmem %s312_s20, 64  ;;  %s2509_s9 = smov [#allocation9]  }
  0x38   : > { %p2289_p10 = scmp.ne.s32.totalorder %s312_s20, %s2288_s17  ;;  %s2293_s26 = sshll.u32 %s2509_s9, 4  ;;  %s2294_s26 = int_to_ptr.vmem [resolvable:$false] %s2293_s26 }
  0x39   : > { %s2295_s13 = scalar_lea.vmem %s2294_s26, 128  ;;  %p2296_p5 = scmp.lt.s32.totalorder %s312_s20, %s2294_s26 }
  0x3a   : > { %s309_s19 = scalar_lea.hbm %s3109_s1, %s2660_s8  ;;  %p2291_p13 = pnand %p2289_p10, %p3090_p9 }
  0x3b   : > { %p2297_p7 = scmp.lt.s32.totalorder %s2295_s13, %s2288_s17 }
  0x3c   : > { %p2292_p0 = pneg %p2291_p13 }
  0x3d   : > { %p2298_p1 = por %p2297_p7, %p2296_p5 }
  0x3f   : > { %p2299_p12 = pnand %p2298_p1, %p2292_p0 }
  0x41   : > { %2302 = shalt.err (!%p2299_p12)
}
  0x42   : > { %2135 = dma.hbm_to_vmem [thread:$0]  (!%p2665_p2), %s309_s19, 64, %s312_s20, %s2675_s25  }
  0x43   : > { %s2314_s3 = scalar_lea.vmem %s254_s11, 256  ;;  %p3110_p10 = pneg %p2621_p11 }
  0x44   : > { %p2315_p6 = scmp.ne.s32.totalorder %s254_s11, %s2314_s3  ;;  %p2322_p3 = scmp.lt.s32.totalorder %s254_s11, %s254_s11 }
  0x45   : > { %p2323_p4 = scmp.lt.s32.totalorder %s2314_s3, %s2314_s3 }
  0x46   : > { %p2317_p13 = pnand %p2315_p6, %p3110_p10 }
  0x47   : > { %p2324_p8 = por %p2323_p4, %p2322_p3 }
  0x48   : > { %p2318_p9 = pneg %p2317_p13 }
  0x4a   : > { %p2325_p5 = pnand %p2324_p8, %p2318_p9 }
  0x4c   : > { %2328 = shalt.err (!%p2325_p5)
}
  0x4d   : > { %s3111_s26 = smov 4   ;;  %s3112_s14 = smov 64  }
  0x4e   : > { %s3113_s4 = sld [smem:[#allocation29_spill]]  ;;  %s2510_s20 = smov [#allocation15]  }
  0x4f   : > { %s266_s16 = sshll.u32 %s2510_s20, 4  ;;  %p3114_p6 = pmov %p3110_p10  ;;  %s267_s16 = int_to_ptr.vmem [resolvable:$true] %s266_s16 }
  0x50   : > { %s2340_s19 = scalar_lea.vmem %s267_s16, 256  ;;  %p2348_p12 = scmp.lt.s32.totalorder %s267_s16, %s267_s16 }
  0x51   : > { %p2341_p1 = scmp.ne.s32.totalorder %s267_s16, %s2340_s19  ;;  %p2349_p3 = scmp.lt.s32.totalorder %s2340_s19, %s2340_s19 }
  0x53   : > { %p2343_p4 = pnand %p2341_p1, %p3114_p6  ;;  %p2350_p9 = por %p2349_p3, %p2348_p12 }
  0x54   : > { %2125 = dma.hbm_to_vmem [thread:$0]  (!%p2621_p11), %s3113_s4, 256, %s254_s11, [#allocation13], %s3112_s14, %s3112_s14, %s3111_s26  }
  0x55   : > { %p2344_p8 = pneg %p2343_p4 }
  0x57   : > { %p2351_p0 = pnand %p2350_p9, %p2344_p8 }
  0x59   : > { %2354 = shalt.err (!%p2351_p0)
}
  0x5a   : > { %2128 = dma.hbm_to_vmem [thread:$0]  (!%p2621_p11), %s3077_s5, 256, %s267_s16, [#allocation16], %s3112_s14, %s3112_s14, %s3111_s26  }
  0x5b   : > { %s290_s9 = scalar_lea.hbm %s3072_s0, %s2660_s8  ;;  %s284_s15 = scalar_lea.vmem [#allocation6], %s2657_s28 }
  0x5c   : > { %s292_s20 = sshll.u32 %s284_s15, 4  ;;  %s3115_s19 = sand.u32 1, %s2491_s23   ;;  %s293_s20 = int_to_ptr.vmem [resolvable:$true] %s292_s20 }
  0x5d   : > { %s281_s10 = scalar_lea.sflag [#allocation7], %s3115_s19  ;;  %s2368_s1 = scalar_lea.vmem %s293_s20, 64 }
  0x5e   : > { %p2369_p7 = scmp.ne.s32.totalorder %s293_s20, %s2368_s1  ;;  %p3116_p10 = pneg %p2665_p2 }
  0x5f   : > { %s2511_s11 = smov [#allocation6]  }
  0x60   : > { %p2371_p13 = pnand %p2369_p7, %p3116_p10  ;;  %s2373_s17 = sshll.u32 %s2511_s11, 4  ;;  %s2374_s17 = int_to_ptr.vmem [resolvable:$false] %s2373_s17 }
  0x61   : > { %s2375_s4 = scalar_lea.vmem %s2374_s17, 128  ;;  %p2376_p11 = scmp.lt.s32.totalorder %s293_s20, %s2374_s17 }
  0x62   : > { %p2372_p5 = pneg %p2371_p13  ;;  %p2377_p1 = scmp.lt.s32.totalorder %s2375_s4, %s2368_s1 }
  0x64   : > { %p2378_p6 = por %p2377_p1, %p2376_p11 }
  0x66   : > { %p2379_p4 = pnand %p2378_p6, %p2372_p5 }
  0x68   : > { %2382 = shalt.err (!%p2379_p4)
}
  0x69   : > { %2132 = dma.hbm_to_vmem [thread:$0]  (!%p2665_p2), %s290_s9, 64, %s293_s20, %s281_s10  }
  0x6a   : > { %s329_s16 = scalar_lea.hbm %s3074_s2, %s2660_s8  ;;  %s322_s13 = scalar_lea.vmem [#allocation11], %s2657_s28 }
  0x6b   : > { %s331_s3 = sshll.u32 %s322_s13, 4  ;;  %p3117_p12 = pmov %p3116_p10  ;;  %s332_s3 = int_to_ptr.vmem [resolvable:$true] %s331_s3 }
  0x6c   : > { %s2396_s15 = scalar_lea.vmem %s332_s3, 64  ;;  %s2512_s1 = smov [#allocation11]  }
  0x6d   : > { %p2397_p8 = scmp.ne.s32.totalorder %s332_s3, %s2396_s15  ;;  %s2401_s4 = sshll.u32 %s2512_s1, 4  ;;  %s2402_s4 = int_to_ptr.vmem [resolvable:$false] %s2401_s4 }
  0x6e   : > { %s2403_s19 = scalar_lea.vmem %s2402_s4, 128  ;;  %p2404_p0 = scmp.lt.s32.totalorder %s332_s3, %s2402_s4 }
  0x6f   : > { %p2399_p3 = pnand %p2397_p8, %p3117_p12  ;;  %p2405_p7 = scmp.lt.s32.totalorder %s2403_s19, %s2396_s15 }
  0x71   : > { %p2400_p9 = pneg %p2399_p3  ;;  %p2406_p10 = por %p2405_p7, %p2404_p0 }
  0x73   : > { %p2407_p13 = pnand %p2406_p10, %p2400_p9 }
  0x75   : > { %2410 = shalt.err (!%p2407_p13)
}
  0x76   : > { %2138 = dma.hbm_to_vmem [thread:$0]  (!%p2665_p2), %s329_s16, 64, %s332_s3, %s2675_s25  }
  0x77   : > { %p3118_p5 = scmp.ne.s32.totalorder %s3101_s7, 0 }
  0x78   : > { %s2733_s28 = sand.u32 (!%p3118_p5), 1, %s2487_s22   ;;  %p3119_p11 = scmp.ne.s32.totalorder (!%p3118_p5), %s3099_s29, 0 }
  0x79   : > { %340 = sbr.rel (%p3118_p5) target bundleno = 1633 (0x661), region = 44  ;;  %s2736_s8 = sshll.u32 (!%p3118_p5), %s2733_s28, 2 }
  0x7a   : > { %s343_s9 = scalar_lea.sflag (!%p3118_p5), [#allocation7], %s2733_s28  ;;  %s346_s20 = scalar_lea.vmem (!%p3118_p5), [#allocation6], %s2736_s8 }
  0x7e   : > { %2462 = dma.done.wait (%p3119_p11), %s343_s9, 64  }
  0x7f   : > { %2464 = vsyncadd (%p3119_p11), %s343_s9, 4294967232  ;;  %s351_s25 = sand.u32 1, %s2593_s27   ;;  %s355_s12 = scalar_lea.vmem [#allocation9], %s2736_s8 }
  0x80   : > { %s352_s7 = scalar_lea.sflag [#allocation10], %s351_s25 }
  0x81   : > { %2466 = dma.done.wait (%p3119_p11), %s352_s7, 128  }
  0x82   : > { %2468 = vsyncadd (%p3119_p11), %s352_s7, 4294967168  ;;  %s364_s10 = scalar_lea.vmem [#allocation11], %s2736_s8  ;;  %p3120_p2 = scmp.eq.s32.totalorder %s2593_s27, 0 }
  0x84   : > { %2470 = dma.done.wait (%p3120_p2), [#allocation13], 512   ;;  %p3121_p1 = pmov %p3120_p2 }
  0x86   : > { %2472 = vsyncadd (%p3121_p1), [#allocation13], 4294966784  ;;  %p3122_p6 = pmov %p3121_p1 }
  0x87   : > { %p3123_p4 = pmov %p3121_p1 }
  0x88   : > { %2474 = dma.done.wait (%p3122_p6), [#allocation16], 256  }
  0x89   : > { %2476 = vsyncadd (%p3123_p4), [#allocation16], 4294967040  ;;  %v2513_v0 = vmov 0.0   ;;  %vm2514_vm0 = vmmov 0   ;;  %v2219_v1 = vld [vmem:[#allocation12 + $0x8] sm:$0xff]   ;;  %v2220_v2 = vld [vmem:[#allocation14 + $0x8] sm:$0xff]   ;;  %v496_v17 = vlaneseq }
  0x8a   : > { %2027 = vmatprep.subr.bf16.mxu0 %v2513_v0  ;;  %2035 = vmatprep.subr.bf16.mxu1 %v2513_v0  ;;  %v2221_v3 = vld [vmem:[#allocation12] sm:$0xff]   ;;  %v2222_v4 = vld [vmem:[#allocation14] sm:$0xff]   ;;  %v420_v5 = vld [vmem:[%s346_s20] sm:$0xf]  ;;  %vm437_vm1 = vcmask 261120   ;;  %s2515_s27 = smov 104  }
  0x8b   : > { %2031 = vmatprep.mubr.msk.bf16.mxu0 %vm2514_vm0, %v2513_v0  ;;  %2039 = vmatprep.mubr.msk.bf16.mxu1 %vm2514_vm0, %v2513_v0  ;;  %v650_v6 = vld [vmem:[%s355_s12] sm:$0xf]  ;;  %s2516_s29 = smov 120   ;;  %s2517_s11 = smov 112   ;;  %vm645_vm2 = vcmask 64512   ;;  %v497_v21 = vshrl.u32 %v496_v17, 7 }
  0x8c   : > { %2028 = vmatpush3.bf16.msra.mxu0 %v2219_v1  ;;  %2036 = vmatpush3.bf16.msra.mxu1 %v2220_v2  ;;  %646 = vst.msk [vmem:[#allocation5] sm:$0xff] %vm645_vm2, %v2513_v0  ;;  %647 = vst.msk [vmem:[#allocation5 + $0x8] sm:$0xff] %vm645_vm2, %v2513_v0  ;;  %v2518_v15 = vmov 1983009808   ;;  %v2519_v18 = vmov 1934713408  }
  0x8d   : > { %2029 = vmatprep.subr.bf16.mxu0 %v2513_v0  ;;  %2037 = vmatprep.subr.bf16.mxu1 %v2513_v0  ;;  %648 = vst.msk [vmem:[#allocation5 + $0x10] sm:$0xff] %vm645_vm2, %v2513_v0  ;;  %649 = vst.msk [vmem:[#allocation5 + $0x18] sm:$0xff] %vm645_vm2, %v2513_v0  ;;  %v494_v16 = vunpack.c.l.s4 %v2518_v15  ;;  %v526_v19 = vunpack.c.l.s4 %v2519_v18  ;;  %vm631_vm3 = vcmask 60416   ;;  %vm636_vm4 = vcmask 7168   ;;  %s2522_s17 = smov 96   ;;  %s2523_s26 = smov 16  }
  0x8e   : > { %641 = vst.msk [vmem:[#allocation4] sm:$0xff] %vm636_vm4, %v2513_v0  ;;  %642 = vst.msk [vmem:[#allocation4 + $0x8] sm:$0xff] %vm636_vm4, %v2513_v0  ;;  %vm1332_vm5 = vcmask 1043456   ;;  %s2524_s14 = smov 8   ;;  %s2525_s16 = smov 24   ;;  %vm1714_vm6 = vcmask 130048  }
  0x8f   : > { %v495_v20 = vunpack.c.0.s8 %v494_v16  ;;  %v527_v24 = vunpack.c.0.s8 %v526_v19  ;;  %643 = vst.msk [vmem:[#allocation4 + $0x10] sm:$0xff] %vm636_vm4, %v2513_v0  ;;  %644 = vst.msk [vmem:[#allocation4 + $0x18] sm:$0xff] %vm636_vm4, %v2513_v0  ;;  %vm1716_vm7 = vcmask 195584   ;;  %s1972_s13 = sshll.u32 %s2733_s28, 3  ;;  %s1999_s3 = sshll.u32 %s2495_s24, 7 }
  0x90   : > { %2030 = vmatpush3.bf16.msra.mxu0 %v2221_v3  ;;  %2038 = vmatpush3.bf16.msra.mxu1 %v2222_v4  ;;  %s414_s15 = scalar_lea.vmem [#allocation17], %s1972_s13  ;;  %s3023_s8 = scalar_lea.hbm %s3078_s6, %s1999_s3 }
  0x91   : > { %2043 = vmatprep.subr.bf16.mxu0 %v2513_v0  ;;  %2049 = vmatprep.subr.bf16.mxu1 %v2513_v0  ;;  %v2788_v25 = vsub.s32 %v495_v20, %v497_v21  ;;  %v2792_v32 = vsub.s32 %v527_v24, %v497_v21  ;;  %s1794_s1 = sshll.u32 %s414_s15, 4  ;;  %s1780_s9 = scalar_lea.sflag [#allocation8], %s2733_s28  ;;  %s3025_s1 = int_to_ptr.vmem [resolvable:$true] %s1794_s1 }
  0x92   : > { %s2411_s20 = scalar_lea.vmem %s3025_s1, 128  ;;  %p3124_p12 = scmp.ne.s32.totalorder %s3106_s18, 0 }
  0x93   : > { %2032 = vmatmul.mubr.msk.bf16.vlgmr.msra.gmra.mxu0 %vm437_vm1, %v420_v5  ;;  %2040 = vmatmul.mubr.msk.bf16.vlgmr.msra.gmra.mxu1 %vm437_vm1, %v650_v6  ;;  %p2412_p8 = scmp.ne.s32.totalorder %s3025_s1, %s2411_s20  ;;  %s2526_s24 = smov [#allocation17]  }
  0x94   : > { %2045 = vmatprep.mubr.msk.bf16.mxu0 %vm2514_vm0, %v2513_v0  ;;  %2051 = vmatprep.mubr.msk.bf16.mxu1 %vm2514_vm0, %v2513_v0  ;;  %s2415_s25 = sshll.u32 %s2526_s24, 4  ;;  %s2416_s25 = int_to_ptr.vmem [resolvable:$false] %s2415_s25 }
  0x95   : > { %p2413_p3 = pnand %p2412_p8, %p3124_p12  ;;  %s2417_s7 = scalar_lea.vmem %s2416_s25, 256 }
  0x96   : > { %p2418_p0 = scmp.lt.s32.totalorder %s3025_s1, %s2416_s25  ;;  %p2419_p7 = scmp.lt.s32.totalorder %s2417_s7, %s2411_s20 }
  0x97   : > { %p2414_p9 = pneg %p2413_p3 }
  0x98   : > { %p2420_p10 = por %p2419_p7, %p2418_p0 }
  0x9a   : > { %p2421_p13 = pnand %p2420_p10, %p2414_p9 }
 0x153   : > { %v475_v7 = vpop.f32.mrf.mxu0  ;;  %v2775_v8 = vpop.f32.mrf.mxu1 }
 0x154   : > { %488 = vrot.lane.b32.xlu1 %v475_v7, %s2515_s27  ;;  %482 = vrot.lane.b32.xlu0 %v475_v7, %s2516_s29 }
 0x155   : > { %v2033_v9 = vpop.f32.mrf.mxu0  ;;  %v2041_v10 = vpop.f32.mrf.mxu1 }
 0x157   : > { %v478_v11 = vpop.f32.mrf.mxu0  ;;  %v708_v12 = vpop.f32.mrf.mxu1 }
 0x158   : > { %712 = vrot.lane.b32.xlu1 %v2775_v8, %s2516_s29  ;;  %485 = vrot.lane.b32.xlu0 %v475_v7, %s2517_s11 }
 0x159   : > { %v2034_v13 = vpop.f32.mrf.mxu0  ;;  %v2042_v14 = vpop.f32.mrf.mxu1 }
 0x15c   : > { %718 = vrot.lane.b32.xlu1 %v2775_v8, %s2515_s27  ;;  %715 = vrot.lane.b32.xlu0 %v2775_v8, %s2517_s11 }
 0x1c6   : > { %v489_v22 = vpop.permute.xlu1 %488  ;;  %v483_v23 = vpop.permute.xlu0 %482 }
 0x1c7   : > { %v507_v26 = vcombine.low %v483_v23, %v489_v22  ;;  %v508_v27 = vcombine.high %v483_v23, %v489_v22 }
 0x1c9   : > { %v515_v33 = vrot.slane %v507_v26, %v2788_v25  ;;  %v522_v34 = vrot.slane %v508_v27, %v2788_v25 }
 0x1ca   : > { %v2790_v28 = vpop.permute.xlu1 %712  ;;  %v486_v29 = vpop.permute.xlu0 %485 }
 0x1cb   : > { %v491_v30 = vcombine.low %v475_v7, %v486_v29  ;;  %v492_v31 = vcombine.high %v475_v7, %v486_v29 }
 0x1cd   : > { %v499_v35 = vrot.slane %v491_v30, %v2788_v25  ;;  %v506_v36 = vrot.slane %v492_v31, %v2788_v25 }
 0x1ce   : > { %v2798_v37 = vpop.permute.xlu1 %718  ;;  %v2800_v38 = vpop.permute.xlu0 %715 }
 0x1cf   : > { %v523_v39 = vcombine.low %v499_v35, %v515_v33  ;;  %v524_v40 = vcombine.high %v499_v35, %v515_v33  ;;  %v539_v41 = vcombine.low %v506_v36, %v522_v34  ;;  %v540_v42 = vcombine.high %v506_v36, %v522_v34 }
 0x1d0   : > { %v737_v43 = vcombine.low %v2790_v28, %v2798_v37  ;;  %v738_v44 = vcombine.high %v2790_v28, %v2798_v37  ;;  %v721_v45 = vcombine.low %v2775_v8, %v2800_v38  ;;  %v722_v46 = vcombine.high %v2775_v8, %v2800_v38 }
 0x1d1   : > { %v531_v47 = vrot.slane %v523_v39, %v2792_v32  ;;  %v538_v48 = vrot.slane %v524_v40, %v2792_v32  ;;  %v547_v49 = vrot.slane %v539_v41, %v2792_v32  ;;  %v554_v50 = vrot.slane %v540_v42, %v2792_v32 }
 0x1d2   : > { %v745_v51 = vrot.slane %v737_v43, %v2788_v25  ;;  %v752_v52 = vrot.slane %v738_v44, %v2788_v25  ;;  %v729_v53 = vrot.slane %v721_v45, %v2788_v25  ;;  %v736_v54 = vrot.slane %v722_v46, %v2788_v25 }
 0x1d3   : > { %v559_v55 = vcombine.low %v531_v47, %v538_v48  ;;  %v1976_v56 = vcombine.high %v531_v47, %v538_v48  ;;  %v575_v57 = vcombine.low %v547_v49, %v554_v50  ;;  %v1977_v58 = vcombine.high %v547_v49, %v554_v50 }
 0x1d4   : > { %v753_v59 = vcombine.low %v729_v53, %v745_v51  ;;  %v754_v60 = vcombine.high %v729_v53, %v745_v51  ;;  %v769_v61 = vcombine.low %v736_v54, %v752_v52  ;;  %v770_v62 = vcombine.high %v736_v54, %v752_v52 }
 0x1d5   : > { %v566_v63 = vrot.slane %v559_v55, %v2788_v25  ;;  %v574_v1 = vrot.slane %v1976_v56, %v2788_v25  ;;  %v582_v2 = vrot.slane %v575_v57, %v2788_v25  ;;  %v590_v3 = vrot.slane %v1977_v58, %v2788_v25 }
 0x1d6   : > { %v761_v4 = vrot.slane %v753_v59, %v2792_v32  ;;  %v768_v5 = vrot.slane %v754_v60, %v2792_v32  ;;  %v777_v6 = vrot.slane %v769_v61, %v2792_v32  ;;  %v784_v7 = vrot.slane %v770_v62, %v2792_v32 }
 0x1d7   : > { %v591_v9 = vcombine.low %v566_v63, %v574_v1  ;;  %v592_v10 = vcombine.high %v566_v63, %v574_v1  ;;  %v607_v11 = vcombine.low %v582_v2, %v590_v3  ;;  %v608_v12 = vcombine.high %v582_v2, %v590_v3  ;;  %v1013_v63 = vld [vmem:[%s364_s10] sm:$0xf] }
 0x1d8   : > { %v789_v13 = vcombine.low %v761_v4, %v768_v5  ;;  %v1981_v14 = vcombine.high %v761_v4, %v768_v5  ;;  %v805_v15 = vcombine.low %v777_v6, %v784_v7  ;;  %v1982_v16 = vcombine.high %v777_v6, %v784_v7 }
 0x1d9   : > { %v599_v17 = vrot.slane %v591_v9, %v2792_v32  ;;  %v606_v18 = vrot.slane %v592_v10, %v2792_v32  ;;  %v615_v19 = vrot.slane %v607_v11, %v2792_v32  ;;  %v622_v20 = vrot.slane %v608_v12, %v2792_v32 }
 0x1da   : > { %v796_v21 = vrot.slane %v789_v13, %v2788_v25  ;;  %v804_v22 = vrot.slane %v1981_v14, %v2788_v25  ;;  %v812_v23 = vrot.slane %v805_v15, %v2788_v25  ;;  %v820_v24 = vrot.slane %v1982_v16, %v2788_v25 }
 0x1db   : > { %v623_v26 = vcombine.low %v599_v17, %v615_v19  ;;  %v624_v27 = vcombine.high %v599_v17, %v615_v19  ;;  %v625_v29 = vcombine.low %v606_v18, %v622_v20  ;;  %v626_v30 = vcombine.high %v606_v18, %v622_v20 }
 0x1dc   : > { %v821_v31 = vcombine.low %v796_v21, %v804_v22  ;;  %v837_v33 = vcombine.low %v812_v23, %v820_v24  ;;  %v822_v34 = vcombine.high %v796_v21, %v804_v22  ;;  %v838_v35 = vcombine.high %v812_v23, %v820_v24 }
 0x1dd   : > { %v627_v36 = vpack.c.bf16 %v623_v26, %v623_v26  ;;  %v628_v39 = vpack.c.bf16 %v624_v27, %v624_v27  ;;  %v629_v40 = vpack.c.bf16 %v625_v29, %v625_v29  ;;  %v630_v41 = vpack.c.bf16 %v626_v30, %v626_v30 }
 0x1de   : > { %v829_v42 = vrot.slane %v821_v31, %v2792_v32  ;;  %v845_v43 = vrot.slane %v837_v33, %v2792_v32  ;;  %v836_v46 = vrot.slane %v822_v34, %v2792_v32  ;;  %v852_v47 = vrot.slane %v838_v35, %v2792_v32 }
 0x1df   : > { %632 = vst.msk [vmem:[#allocation2] sm:$0xf] %vm631_vm3, %v627_v36  ;;  %633 = vst.msk [vmem:[#allocation2 + $0x4] sm:$0xf] %vm631_vm3, %v628_v39  ;;  %v2520_v62 = vmov -inf   ;;  %v1014_v1 = vunpack.c.l.bf16 %v1013_v63  ;;  %v2521_v29 = vmov 0  }
 0x1e0   : > { %634 = vst.msk [vmem:[#allocation2 + $0x8] sm:$0xf] %vm631_vm3, %v629_v40  ;;  %635 = vst.msk [vmem:[#allocation2 + $0xc] sm:$0xf] %vm631_vm3, %v630_v41  ;;  %v853_v44 = vcombine.low %v829_v42, %v845_v43  ;;  %v854_v45 = vcombine.high %v829_v42, %v845_v43  ;;  %v855_v52 = vcombine.low %v836_v46, %v852_v47  ;;  %2217 = vset.pattern.permute.xlu1 %v2521_v29 }
 0x1e1   : > { %v856_v53 = vcombine.high %v836_v46, %v852_v47  ;;  %638 = vst.msk [vmem:[#allocation3 + $0x8] sm:$0xff] %vm636_vm4, %v2520_v62  ;;  %637 = vst.msk [vmem:[#allocation3] sm:$0xff] %vm636_vm4, %v2520_v62  ;;  %2218 = vset.pattern.permute.xlu0 %v2521_v29 }
 0x1e2   : > { %v857_v48 = vpack.c.bf16 %v853_v44, %v853_v44  ;;  %v858_v49 = vpack.c.bf16 %v854_v45, %v854_v45  ;;  %v859_v54 = vpack.c.bf16 %v855_v52, %v855_v52  ;;  %639 = vst.msk [vmem:[#allocation3 + $0x10] sm:$0xff] %vm636_vm4, %v2520_v62  ;;  %640 = vst.msk [vmem:[#allocation3 + $0x18] sm:$0xff] %vm636_vm4, %v2520_v62 }
 0x1e3   : > { %v860_v55 = vpack.c.bf16 %v856_v53, %v856_v53 }
 0x1e4   : > { %v1024_v50 = vsel %vm645_vm2, %v857_v48, 0  ;;  %v1070_v51 = vsel %vm645_vm2, %v858_v49, 0  ;;  %v1116_v58 = vsel %vm645_vm2, %v859_v54, 0 }
 0x1e5   : > { %2044 = vmatpush3.bf16.xpose.msra.mxu0 %v1024_v50  ;;  %2050 = vmatpush3.bf16.xpose.msra.mxu1 %v1070_v51  ;;  %v1162_v59 = vsel %vm645_vm2, %v860_v55, 0 }
 0x1e6   : > { %2055 = vmatprep.subr.bf16.mxu0 %v2513_v0  ;;  %2061 = vmatprep.subr.bf16.mxu1 %v2513_v0  ;;  %v1015_v56 = vld [vmem:[#allocation2] sm:$0xf]  ;;  %v1016_v57 = vld [vmem:[#allocation2 + $0x4] sm:$0xf] }
 0x1e7   : > { %v1017_v60 = vld [vmem:[#allocation2 + $0x8] sm:$0xf]  ;;  %v1018_v61 = vld [vmem:[#allocation2 + $0xc] sm:$0xf] }
 0x1e8   : > { %v2886_v30 = vld [vmem:[#allocation3 + $0x8] sm:$0xff]  ;;  %v2888_v31 = vld [vmem:[#allocation3] sm:$0xff] }
 0x1e9   : > { %v2906_v41 = vld [vmem:[#allocation3 + $0x10] sm:$0xff]  ;;  %v2912_v44 = vld [vmem:[#allocation3 + $0x18] sm:$0xff] }
 0x1ec   : > { %2046 = vmatmul.mubr.msk.bf16.vlgmr.msra.gmra.mxu0 %vm645_vm2, %v1015_v56  ;;  %2052 = vmatmul.mubr.msk.bf16.vlgmr.msra.gmra.mxu1 %vm645_vm2, %v1016_v57 }
 0x1ed   : > { %2056 = vmatpush3.bf16.xpose.msra.mxu0 %v1116_v58  ;;  %2062 = vmatpush3.bf16.xpose.msra.mxu1 %v1162_v59 }
 0x1ee   : > { %2057 = vmatprep.mubr.msk.bf16.mxu0 %vm2514_vm0, %v2513_v0  ;;  %2063 = vmatprep.mubr.msk.bf16.mxu1 %vm2514_vm0, %v2513_v0 }
 0x1ef   : > { %2067 = vmatprep.subr.bf16.mxu0 %v2513_v0  ;;  %2073 = vmatprep.subr.bf16.mxu1 %v2513_v0 }
 0x1f4   : > { %2058 = vmatmul.mubr.msk.bf16.vlgmr.msra.gmra.mxu0 %vm645_vm2, %v1017_v60  ;;  %2064 = vmatmul.mubr.msk.bf16.vlgmr.msra.gmra.mxu1 %vm645_vm2, %v1018_v61 }
 0x1f5   : > { %2069 = vmatprep.mubr.msk.bf16.mxu0 %vm2514_vm0, %v2513_v0  ;;  %2075 = vmatprep.mubr.msk.bf16.mxu1 %vm2514_vm0, %v2513_v0 }
 0x2ac   : > { %v1060_v2 = vpop.f32.mrf.mxu0  ;;  %v1106_v3 = vpop.f32.mrf.mxu1 }
 0x2ad   : > { %v1061_v4 = vadd.f32 %v1060_v2, %v1014_v1  ;;  %v1107_v5 = vadd.f32 %v1106_v3, %v1014_v1 }
 0x2ae   : > { %v2047_v6 = vpop.f32.mrf.mxu0  ;;  %v2053_v7 = vpop.f32.mrf.mxu1 }
 0x2af   : > { %v1211_v9 = vsel %vm645_vm2, %v1107_v5, -inf  ;;  %v1208_v10 = vsel %vm645_vm2, %v1061_v4, -inf }
 0x2b0   : > { %1212 = vmax.xlane.f32.xlu1 %v1211_v9  ;;  %v1109_v11 = vpop.f32.mrf.mxu1  ;;  %1209 = vmax.xlane.f32.xlu0 %v1208_v10  ;;  %v1063_v12 = vpop.f32.mrf.mxu0 }
 0x2b2   : > { %v2048_v13 = vpop.f32.mrf.mxu0  ;;  %v2054_v14 = vpop.f32.mrf.mxu1 }
 0x2b4   : > { %v1152_v15 = vpop.f32.mrf.mxu0  ;;  %v1198_v16 = vpop.f32.mrf.mxu1 }
 0x2b5   : > { %v2878_v17 = vadd.f32 %v1152_v15, %v1014_v1  ;;  %v2880_v20 = vadd.f32 %v1198_v16, %v1014_v1 }
 0x2b6   : > { %v2059_v18 = vpop.f32.mrf.mxu0  ;;  %v2065_v19 = vpop.f32.mrf.mxu1 }
 0x2b7   : > { %v1214_v21 = vsel %vm645_vm2, %v2878_v17, -inf  ;;  %v1217_v27 = vsel %vm645_vm2, %v2880_v20, -inf }
 0x2b8   : > { %v1201_v22 = vpop.f32.mrf.mxu1  ;;  %1215 = vmax.xlane.f32.xlu0 %v1214_v21  ;;  %v1155_v23 = vpop.f32.mrf.mxu0 }
 0x2ba   : > { %v2060_v24 = vpop.f32.mrf.mxu0  ;;  %v2066_v26 = vpop.f32.mrf.mxu1 }
 0x2bc   : > { %1218 = vmax.xlane.f32.xlu0 %v1217_v27 }
 0x339   : > { %v1213_v33 = vpop.xlane.xlu1 %1212  ;;  %v1210_v34 = vpop.xlane.xlu0 %1209 }
 0x33a   : > { %v2891_v35 = vmax.f32 %v2886_v30, %v1213_v33  ;;  %v2894_v36 = vmax.f32 %v2888_v31, %v1210_v34 }
 0x33c   : > { %v1225_v39 = vsub.f32 %v2886_v30, %v2891_v35  ;;  %1523 = vst.msk [vmem:[#allocation3 + $0x8] sm:$0xff] %vm636_vm4, %v2891_v35  ;;  %v1224_v40 = vsub.f32 %v2888_v31, %v2894_v36  ;;  %1522 = vst.msk [vmem:[#allocation3] sm:$0xff] %vm636_vm4, %v2894_v36  ;;  %1238 = vperm.xlu1 %2217, %v2894_v36   ;;  %1243 = vperm.xlu0 %2218, %v2891_v35   ;;  %v1269_v30 = vld [vmem:[#allocation4 + $0x8] sm:$0xff] }
 0x340   : > { %861 = vrot.lane.b32.xlu1 %v2775_v8, %s2522_s17 }
 0x341   : > { %v1216_v42 = vpop.xlane.xlu0 %1215 }
 0x342   : > { %v2910_v43 = vmax.f32 %v2906_v41, %v1216_v42 }
 0x344   : > { %v1226_v45 = vsub.f32 %v2906_v41, %v2910_v43  ;;  %1524 = vst.msk [vmem:[#allocation3 + $0x10] sm:$0xff] %vm636_vm4, %v2910_v43  ;;  %863 = vrot.lane.b32.xlu1 %v2790_v28, %s2522_s17  ;;  %v1230_v41 = vmul.f32 1.442695, %v1225_v39 }
 0x345   : > { %v1219_v46 = vpop.xlane.xlu0 %1218 }
 0x346   : > { %v2920_v47 = vmax.f32 %v2912_v44, %v1219_v46  ;;  %v1232_v31 = vmul.f32 1.442695, %v1226_v45 }
 0x348   : > { %v1227_v8 = vsub.f32 %v2912_v44, %v2920_v47  ;;  %1525 = vst.msk [vmem:[#allocation3 + $0x18] sm:$0xff] %vm636_vm4, %v2920_v47  ;;  %865 = vrot.lane.b32.xlu1 %v2800_v38, %s2522_s17 }
 0x34c   : > { %867 = vrot.lane.b32.xlu1 %v2798_v37, %s2522_s17 }
 0x350   : > { %1248 = vperm.xlu1 %2217, %v2910_v43  }
 0x354   : > { %1253 = vperm.xlu1 %2217, %v2920_v47  }
 0x3b7   : > { %v1239_v48 = vpop.permute.xlu1 %1238  ;;  %v1244_v28 = vpop.permute.xlu0 %1243 }
 0x3b8   : > { %v1256_v49 = vsub.f32 %v1061_v4, %v1239_v48  ;;  %v1257_v50 = vsub.f32 %v1107_v5, %v1244_v28 }
 0x3ba   : > { %v1260_v51 = vmul.f32 1.442695, %v1256_v49  ;;  %v1262_v52 = vmul.f32 1.442695, %v1257_v50 }
 0x3bb   : > { %v862_v53 = vpop.permute.xlu1 %861 }
 0x3bc   : > { %2225 = vpow2.f32 %v1260_v51 }
 0x3bd   : > { %2227 = vpow2.f32 %v1262_v52 }
 0x3bf   : > { %v864_v54 = vpop.permute.xlu1 %863 }
 0x3c3   : > { %v866_v55 = vpop.permute.xlu1 %865 }
 0x3c4   : > { %v873_v56 = vcombine.low %v862_v53, %v866_v55  ;;  %v874_v57 = vcombine.high %v862_v53, %v866_v55 }
 0x3c6   : > { %v881_v60 = vrot.slane %v873_v56, %v2788_v25  ;;  %v888_v62 = vrot.slane %v874_v57, %v2788_v25 }
 0x3c7   : > { %v868_v38 = vpop.permute.xlu1 %867 }
 0x3c8   : > { %v889_v58 = vcombine.low %v864_v54, %v868_v38  ;;  %v890_v37 = vcombine.high %v864_v54, %v868_v38 }
 0x3c9   : > { %v2930_v59 = vpop.eup %2225 }
 0x3ca   : > { %v2933_v61 = vpop.eup %2227  ;;  %v897_v63 = vrot.slane %v889_v58, %v2788_v25  ;;  %v904_v1 = vrot.slane %v890_v37, %v2788_v25  ;;  %v1276_v2 = vsel %vm645_vm2, %v2930_v59, 0.0 }
 0x3cb   : > { %v1249_v3 = vpop.permute.xlu1 %1248  ;;  %1277 = vadd.xlane.f32.xlu1 %v1276_v2  ;;  %v1279_v4 = vsel %vm645_vm2, %v2933_v61, 0.0 }
 0x3cc   : > { %v905_v5 = vcombine.low %v881_v60, %v897_v63  ;;  %v906_v6 = vcombine.high %v881_v60, %v897_v63  ;;  %v921_v7 = vcombine.low %v888_v62, %v904_v1  ;;  %v922_v9 = vcombine.high %v888_v62, %v904_v1  ;;  %1280 = vadd.xlane.f32.xlu0 %v1279_v4 }
 0x3cd   : > { %v1258_v10 = vsub.f32 %v2878_v17, %v1249_v3  ;;  %v1325_v60 = vpack.c.bf16 %v2930_v59, %v2930_v59  ;;  %v1228_v62 = vmul.f32 1.442695, %v1224_v40  ;;  %v1326_v1 = vpack.c.bf16 %v2933_v61, %v2933_v61 }
 0x3ce   : > { %v913_v11 = vrot.slane %v905_v5, %v2792_v32  ;;  %v920_v12 = vrot.slane %v906_v6, %v2792_v32  ;;  %v929_v13 = vrot.slane %v921_v7, %v2792_v32  ;;  %v936_v14 = vrot.slane %v922_v9, %v2792_v32 }
 0x3cf   : > { %v1264_v15 = vmul.f32 1.442695, %v1258_v10  ;;  %v1254_v16 = vpop.permute.xlu1 %1253  ;;  %v1234_v61 = vmul.f32 1.442695, %v1227_v8  ;;  %v1268_v8 = vld [vmem:[#allocation4] sm:$0xff] }
 0x3d0   : > { %v941_v18 = vcombine.low %v913_v11, %v920_v12  ;;  %v1983_v19 = vcombine.high %v913_v11, %v920_v12  ;;  %v957_v21 = vcombine.low %v929_v13, %v936_v14  ;;  %v1984_v22 = vcombine.high %v929_v13, %v936_v14  ;;  %v1270_v12 = vld [vmem:[#allocation4 + $0x10] sm:$0xff] }
 0x3d1   : > { %2229 = vpow2.f32 %v1264_v15  ;;  %v1259_v23 = vsub.f32 %v2880_v20, %v1254_v16  ;;  %v1271_v15 = vld [vmem:[#allocation4 + $0x18] sm:$0xff] }
 0x3d2   : > { %v948_v24 = vrot.slane %v941_v18, %v2788_v25  ;;  %v956_v17 = vrot.slane %v1983_v19, %v2788_v25  ;;  %v964_v26 = vrot.slane %v957_v21, %v2788_v25  ;;  %v972_v27 = vrot.slane %v1984_v22, %v2788_v25 }
 0x3d3   : > { %v1266_v29 = vmul.f32 1.442695, %v1259_v23 }
 0x3d4   : > { %v973_v33 = vcombine.low %v948_v24, %v956_v17  ;;  %v989_v34 = vcombine.low %v964_v26, %v972_v27  ;;  %v974_v42 = vcombine.high %v948_v24, %v956_v17  ;;  %v990_v46 = vcombine.high %v964_v26, %v972_v27 }
 0x3d5   : > { %2231 = vpow2.f32 %v1266_v29 }
 0x3d6   : > { %v981_v48 = vrot.slane %v973_v33, %v2792_v32  ;;  %v997_v28 = vrot.slane %v989_v34, %v2792_v32  ;;  %v988_v20 = vrot.slane %v974_v42, %v2792_v32  ;;  %v1004_v49 = vrot.slane %v990_v46, %v2792_v32  ;;  %v1297_v33 = vld [vmem:[#allocation5] sm:$0xff]  ;;  %v1298_v34 = vld [vmem:[#allocation5 + $0x8] sm:$0xff] }
 0x3d7   : > { %2233 = vpow2.f32 %v1228_v62 }
 0x3d8   : > { %v1005_v50 = vcombine.low %v981_v48, %v997_v28  ;;  %v1006_v51 = vcombine.high %v981_v48, %v997_v28  ;;  %v1007_v52 = vcombine.low %v988_v20, %v1004_v49  ;;  %v1008_v53 = vcombine.high %v988_v20, %v1004_v49 }
 0x3d9   : > { %2235 = vpow2.f32 %v1232_v31 }
 0x3da   : > { %v1009_v54 = vpack.c.bf16 %v1005_v50, %v1005_v50  ;;  %v1010_v55 = vpack.c.bf16 %v1006_v51, %v1006_v51  ;;  %v1011_v38 = vpack.c.bf16 %v1007_v52, %v1007_v52  ;;  %v1012_v58 = vpack.c.bf16 %v1008_v53, %v1008_v53 }
 0x3db   : > { %2237 = vpow2.f32 %v1234_v61 }
 0x3dc   : > { %v1334_v56 = vsel %vm1332_vm5, %v1009_v54, 0  ;;  %v1380_v57 = vsel %vm1332_vm5, %v1010_v55, 0  ;;  %v1426_v2 = vsel %vm1332_vm5, %v1011_v38, 0  ;;  %v1472_v59 = vsel %vm1332_vm5, %v1012_v58, 0  ;;  %v1299_v54 = vld [vmem:[#allocation5 + $0x10] sm:$0xff] }
 0x3dd   : > { %2068 = vmatpush3.bf16.msra.mxu0 %v1334_v56  ;;  %2074 = vmatpush3.bf16.msra.mxu1 %v1380_v57  ;;  %2239 = vpow2.f32 %v1230_v41  ;;  %v1300_v56 = vld [vmem:[#allocation5 + $0x18] sm:$0xff] }
 0x3de   : > { %v2230_v37 = vpop.eup %2229  ;;  %2079 = vmatprep.subr.bf16.mxu0 %v2513_v0  ;;  %2085 = vmatprep.subr.bf16.mxu1 %v2513_v0 }
 0x3df   : > { %v1282_v63 = vsel %vm645_vm2, %v2230_v37, 0.0  ;;  %v1327_v40 = vpack.c.bf16 %v2230_v37, %v2230_v37 }
 0x3e0   : > { %1283 = vadd.xlane.f32.xlu1 %v1282_v63  ;;  %2070 = vmatmul.mubr.msk.bf16.vlgmr.msra.gmra.mxu0 %vm645_vm2, %v1325_v60 }
 0x3e1   : > { %2076 = vmatmul.mubr.msk.bf16.vlgmr.msra.gmra.mxu1 %vm645_vm2, %v1326_v1  ;;  %2080 = vmatpush3.bf16.msra.mxu0 %v1426_v2 }
 0x3e2   : > { %v2232_v3 = vpop.eup %2231  ;;  %2086 = vmatpush3.bf16.msra.mxu1 %v1472_v59  ;;  %2081 = vmatprep.mubr.msk.bf16.mxu0 %vm2514_vm0, %v2513_v0 }
 0x3e3   : > { %v1285_v36 = vsel %vm645_vm2, %v2232_v3, 0.0  ;;  %2087 = vmatprep.mubr.msk.bf16.mxu1 %vm2514_vm0, %v2513_v0  ;;  %2091 = vmatprep.subr.bf16.mxu0 %v2513_v0  ;;  %v1328_v4 = vpack.c.bf16 %v2232_v3, %v2232_v3 }
 0x3e4   : > { %1286 = vadd.xlane.f32.xlu0 %v1285_v36  ;;  %v2234_v43 = vpop.eup %2233 }
 0x3e5   : > { %v1272_v35 = vmul.f32 %v2234_v43, %v1268_v8 }
 0x3e6   : > { %v2236_v45 = vpop.eup %2235 }
 0x3e7   : > { %v1274_v13 = vmul.f32 %v2236_v45, %v1270_v12 }
 0x3e8   : > { %2082 = vmatmul.mubr.msk.bf16.vlgmr.msra.gmra.mxu0 %vm645_vm2, %v1327_v40  ;;  %v2238_v44 = vpop.eup %2237 }
 0x3e9   : > { %2088 = vmatmul.mubr.msk.bf16.vlgmr.msra.gmra.mxu1 %vm645_vm2, %v1328_v4  ;;  %2095 = vmatprep.mubr.msk.bf16.mxu0 %vm2514_vm0, %v2513_v0  ;;  %v1275_v19 = vmul.f32 %v2238_v44, %v1271_v15 }
 0x3ea   : > { %v2240_v47 = vpop.eup %2239 }
 0x3eb   : > { %v1273_v5 = vmul.f32 %v2240_v47, %v1269_v30 }
 0x3f1   : > { %1303 = vperm.xlu1 %2217, %v2234_v43  }
 0x3f5   : > { %1313 = vperm.xlu1 %2217, %v2236_v45  }
 0x3f9   : > { %1318 = vperm.xlu1 %2217, %v2238_v44  }
 0x3fa   : > { %1308 = vperm.xlu0 %2218, %v2240_v47  }
 0x454   : > { %v1278_v39 = vpop.xlane.xlu1 %1277 }
 0x455   : > { %v1288_v6 = vadd.f32 %v1278_v39, %v1272_v35  ;;  %v1281_v7 = vpop.xlane.xlu0 %1280 }
 0x456   : > { %v1289_v9 = vadd.f32 %v1281_v7, %v1273_v5 }
 0x457   : > { %1293 = vst.msk [vmem:[#allocation4] sm:$0xff] %vm636_vm4, %v1288_v6 }
 0x458   : > { %1294 = vst.msk [vmem:[#allocation4 + $0x8] sm:$0xff] %vm636_vm4, %v1289_v9 }
 0x45e   : > { %v1529_v10 = vld [vmem:[#allocation4] sm:$0xff] }
 0x45f   : > { %2241 = vrcp.f32 %v1529_v10  ;;  %v1530_v11 = vld [vmem:[#allocation4 + $0x8] sm:$0xff] }
 0x460   : > { %2243 = vrcp.f32 %v1530_v11 }
 0x469   : > { %v1284_v14 = vpop.xlane.xlu1 %1283 }
 0x46a   : > { %v1290_v16 = vadd.f32 %v1284_v14, %v1274_v13 }
 0x46c   : > { %v2242_v18 = vpop.eup %2241  ;;  %1295 = vst.msk [vmem:[#allocation4 + $0x10] sm:$0xff] %vm636_vm4, %v1290_v16 }
 0x46d   : > { %v2244_v21 = vpop.eup %2243  ;;  %v1287_v22 = vpop.xlane.xlu0 %1286  ;;  %1543 = vperm.xlu0 %2218, %v2242_v18   ;;  %v2223_v18 = vld [vmem:[#allocation15 + $0x8] sm:$0xff]  }
 0x46e   : > { %v1291_v23 = vadd.f32 %v1287_v22, %v1275_v19  ;;  %1548 = vperm.xlu1 %2217, %v2244_v21   ;;  %v1304_v29 = vpop.permute.xlu1 %1303  ;;  %2092 = vmatpush3.bf16.msra.mxu0 %v2223_v18 }
 0x46f   : > { %v1321_v46 = vmul.f32 %v1304_v29, %v1297_v33  ;;  %2093 = vmatprep.subr.bf16.mxu0 %v2513_v0  ;;  %v2224_v29 = vld [vmem:[#allocation15] sm:$0xff]  }
 0x470   : > { %1296 = vst.msk [vmem:[#allocation4 + $0x18] sm:$0xff] %vm636_vm4, %v1291_v23 }
 0x472   : > { %v1314_v48 = vpop.permute.xlu1 %1313  ;;  %2094 = vmatpush3.bf16.msra.mxu0 %v2224_v29 }
 0x473   : > { %v1531_v24 = vld [vmem:[#allocation4 + $0x10] sm:$0xff]  ;;  %v1323_v37 = vmul.f32 %v1314_v48, %v1299_v54 }
 0x474   : > { %2245 = vrcp.f32 %v1531_v24 }
 0x475   : > { %v1309_v42 = vpop.permute.xlu0 %1308 }
 0x476   : > { %v1322_v28 = vmul.f32 %v1309_v42, %v1298_v34  ;;  %v1319_v57 = vpop.permute.xlu1 %1318 }
 0x477   : > { %v1532_v17 = vld [vmem:[#allocation4 + $0x18] sm:$0xff]  ;;  %v1324_v62 = vmul.f32 %v1319_v57, %v1300_v56 }
 0x478   : > { %2247 = vrcp.f32 %v1532_v17 }
 0x481   : > { %v2246_v26 = vpop.eup %2245 }
 0x482   : > { %1553 = vperm.xlu0 %2218, %v2246_v26  }
 0x485   : > { %v2248_v27 = vpop.eup %2247 }
 0x486   : > { %1558 = vperm.xlu1 %2217, %v2248_v27  }
 0x4a0   : > { %v1370_v20 = vpop.f32.mrf.mxu0 }
 0x4a1   : > { %v1514_v49 = vadd.f32 %v1370_v20, %v1321_v46  ;;  %v1416_v50 = vpop.f32.mrf.mxu1 }
 0x4a2   : > { %v1515_v51 = vadd.f32 %v1416_v50, %v1322_v28  ;;  %v2071_v52 = vpop.f32.mrf.mxu0 }
 0x4a3   : > { %1518 = vst.msk [vmem:[#allocation5] sm:$0xff] %vm645_vm2, %v1514_v49  ;;  %v2077_v53 = vpop.f32.mrf.mxu1 }
 0x4a4   : > { %1519 = vst.msk [vmem:[#allocation5 + $0x8] sm:$0xff] %vm645_vm2, %v1515_v51  ;;  %v1373_v55 = vpop.f32.mrf.mxu0 }
 0x4a5   : > { %v1419_v38 = vpop.f32.mrf.mxu1 }
 0x4a6   : > { %v2072_v58 = vpop.f32.mrf.mxu0 }
 0x4a7   : > { %v2078_v60 = vpop.f32.mrf.mxu1 }
 0x4a8   : > { %v1462_v63 = vpop.f32.mrf.mxu0 }
 0x4a9   : > { %v1516_v1 = vadd.f32 %v1462_v63, %v1323_v37  ;;  %v1508_v2 = vpop.f32.mrf.mxu1 }
 0x4aa   : > { %v1517_v59 = vadd.f32 %v1508_v2, %v1324_v62  ;;  %v2083_v3 = vpop.f32.mrf.mxu0  ;;  %v1537_v8 = vld [vmem:[#allocation5] sm:$0xff] }
 0x4ab   : > { %1520 = vst.msk [vmem:[#allocation5 + $0x10] sm:$0xff] %vm645_vm2, %v1516_v1  ;;  %v2089_v31 = vpop.f32.mrf.mxu1  ;;  %v1538_v35 = vld [vmem:[#allocation5 + $0x8] sm:$0xff] }
 0x4ac   : > { %1521 = vst.msk [vmem:[#allocation5 + $0x18] sm:$0xff] %vm645_vm2, %v1517_v59  ;;  %v1465_v36 = vpop.f32.mrf.mxu0 }
 0x4ad   : > { %v1511_v40 = vpop.f32.mrf.mxu1 }
 0x4ae   : > { %v2084_v61 = vpop.f32.mrf.mxu0 }
 0x4af   : > { %v2090_v4 = vpop.f32.mrf.mxu1 }
 0x4b2   : > { %v1539_v44 = vld [vmem:[#allocation5 + $0x10] sm:$0xff] }
 0x4b3   : > { %v1540_v39 = vld [vmem:[#allocation5 + $0x18] sm:$0xff] }
 0x4e8   : > { %v1544_v41 = vpop.permute.xlu0 %1543 }
 0x4e9   : > { %v1549_v43 = vpop.permute.xlu1 %1548  ;;  %v1561_v30 = vmul.f32 %v1544_v41, %v1537_v8 }
 0x4ea   : > { %v1562_v6 = vmul.f32 %v1549_v43, %v1538_v35 }
 0x4fd   : > { %v1554_v45 = vpop.permute.xlu0 %1553 }
 0x4fe   : > { %v1563_v47 = vmul.f32 %v1554_v45, %v1539_v44 }
 0x500   : > { %v1565_v7 = vcombine.low %v1561_v30, %v1563_v47  ;;  %v1566_v9 = vcombine.high %v1561_v30, %v1563_v47 }
 0x501   : > { %v1559_v5 = vpop.permute.xlu1 %1558 }
 0x502   : > { %v1564_v10 = vmul.f32 %v1559_v5, %v1540_v39  ;;  %v1573_v13 = vrot.slane %v1565_v7, %v2788_v25  ;;  %v1580_v14 = vrot.slane %v1566_v9, %v2788_v25 }
 0x504   : > { %v1581_v11 = vcombine.low %v1562_v6, %v1564_v10  ;;  %v1582_v12 = vcombine.high %v1562_v6, %v1564_v10 }
 0x506   : > { %v1589_v15 = vrot.slane %v1581_v11, %v2788_v25  ;;  %v1596_v16 = vrot.slane %v1582_v12, %v2788_v25 }
 0x508   : > { %v1597_v19 = vcombine.low %v1573_v13, %v1589_v15  ;;  %v1598_v21 = vcombine.high %v1573_v13, %v1589_v15  ;;  %v1613_v22 = vcombine.low %v1580_v14, %v1596_v16  ;;  %v1614_v23 = vcombine.high %v1580_v14, %v1596_v16 }
 0x50a   : > { %v1605_v24 = vrot.slane %v1597_v19, %v2792_v32  ;;  %v1612_v17 = vrot.slane %v1598_v21, %v2792_v32  ;;  %v1621_v26 = vrot.slane %v1613_v22, %v2792_v32  ;;  %v1628_v27 = vrot.slane %v1614_v23, %v2792_v32 }
 0x50c   : > { %v1633_v33 = vcombine.low %v1605_v24, %v1612_v17  ;;  %v1993_v34 = vcombine.high %v1605_v24, %v1612_v17  ;;  %v1649_v42 = vcombine.low %v1621_v26, %v1628_v27  ;;  %v1994_v46 = vcombine.high %v1621_v26, %v1628_v27 }
 0x50e   : > { %v1640_v48 = vrot.slane %v1633_v33, %v2788_v25  ;;  %v1648_v28 = vrot.slane %v1993_v34, %v2788_v25  ;;  %v1656_v20 = vrot.slane %v1649_v42, %v2788_v25  ;;  %v1664_v49 = vrot.slane %v1994_v46, %v2788_v25 }
 0x510   : > { %v1666_v50 = vcombine.high %v1640_v48, %v1648_v28  ;;  %v1682_v51 = vcombine.high %v1656_v20, %v1664_v49  ;;  %v1665_v52 = vcombine.low %v1640_v48, %v1648_v28  ;;  %v1681_v53 = vcombine.low %v1656_v20, %v1664_v49 }
 0x512   : > { %v1680_v0 = vrot.slane %v1666_v50, %v2792_v32  ;;  %v1696_v54 = vrot.slane %v1682_v51, %v2792_v32  ;;  %v1673_v55 = vrot.slane %v1665_v52, %v2792_v32  ;;  %v1689_v56 = vrot.slane %v1681_v53, %v2792_v32 }
 0x514   : > { %v1699_v57 = vcombine.low %v1680_v0, %v1696_v54  ;;  %v1698_v38 = vcombine.high %v1673_v55, %v1689_v56  ;;  %v1697_v58 = vcombine.low %v1673_v55, %v1689_v56  ;;  %v1700_v25 = vcombine.high %v1680_v0, %v1696_v54 }
 0x516   : > { %1706 = vrot.lane.b32.xlu1 %v1699_v57, %s2523_s26  ;;  %1702 = vrot.lane.b32.xlu0 %v1698_v38, %s2524_s14 }
 0x51a   : > { %1710 = vrot.lane.b32.xlu0 %v1700_v25, %s2525_s16 }
 0x588   : > { %v1703_v37 = vpop.permute.xlu0 %1702  ;;  %v1707_v60 = vpop.permute.xlu1 %1706 }
 0x589   : > { %v1713_v62 = vsel %vm645_vm2, %v1697_v58, %v1703_v37 }
 0x58a   : > { %v1715_v63 = vsel %vm1714_vm6, %v1713_v62, %v1707_v60 }
 0x58c   : > { %v1711_v32 = vpop.permute.xlu0 %1710 }
 0x58d   : > { %v1717_v1 = vsel %vm1716_vm7, %v1715_v63, %v1711_v32 }
 0x58e   : > { %v1718_v2 = vpack.c.bf16 %v1717_v1, %v1717_v1 }
 0x590   : > { %2096 = vmatmul.mubr.msk.bf16.vlgmr.msra.gmra.mxu0 %vm437_vm1, %v1718_v2 }
 0x650   : > { %v1772_v59 = vpop.f32.mrf.mxu0 }
 0x651   : > { %1778 = vst.msk [vmem:[%s414_s15] sm:$0xff] %vm437_vm1, %v1772_v59 }
 0x652   : > { %v2097_v3 = vpop.f32.mrf.mxu0 }
 0x653   : > { %2424 = shalt.err (!%p2421_p13)
}
 0x654   : > { %s2425_s12 = scalar_lea.hbm %s3023_s8, 128  ;;  %s2429_s27 = scalar_lea.hbm %s3078_s6, 256 }
 0x655   : > { %p2426_p5 = scmp.ne.s32.totalorder %s3023_s8, %s2425_s12  ;;  %p2430_p1 = scmp.lt.s32.totalorder %s3023_s8, %s3078_s6 }
 0x656   : > { %p2431_p6 = scmp.lt.s32.totalorder %s2429_s27, %s2425_s12 }
 0x657   : > { %p2427_p11 = pnand %p2426_p5, %p3124_p12 }
 0x658   : > { %p2432_p4 = por %p2431_p6, %p2430_p1 }
 0x659   : > { %p2428_p2 = pneg %p2427_p11 }
 0x65b   : > { %p2433_p8 = pnand %p2432_p4, %p2428_p2 }
 0x65d   : > { %2436 = shalt.err (!%p2433_p8)
}
 0x65e   : > { %2117 = dma.vmem_to_hbm [thread:$0]  (%p3124_p12), %s3025_s1, 128, %s3023_s8, %s1780_s9   ;;  %v1775_v31 = vpop.f32.mrf.mxu0 }
 0x660   : > { %v2098_v36 = vpop.f32.mrf.mxu0 }
 0x661 PF: > { %s3125_s17 = sld [smem:[#allocation24_spill]]  ;;  %s1806_s26 = sand.u32 1, %s2483_s21  }
 0x662   : > { %p3126_p3 = scmp.ne.s32.totalorder %s3100_s30, 0  ;;  %s1807_s14 = scalar_lea.sflag [#allocation8], %s1806_s26 }
 0x667   : > { %p3127_p9 = scmp.ge.s32.totalorder %s3125_s17, 2 }
 0x669   : > { %p2140_p0 = pnand %p3127_p9, %p3126_p3 }
 0x66b   : > { %p2141_p7 = pneg %p2140_p0 }
 0x66d   : > { %2478 = dma.done.wait (%p2141_p7), %s1807_s14, 128  }
 0x66e   : > { %2480 = vsyncadd (%p2141_p7), %s1807_s14, 4294967168  ;;  %s27_s26 = sadd.s32 1, %s3125_s17   ;;  %s3128_s18 = sld [smem:[#allocation26_spill]] }
 0x66f   : > { %p24_p10 = scmp.ge.s32.totalorder %s27_s26, 4   ;;  %s3129_s24 = sld [smem:[#allocation23_spill]] }
 0x670   : > { %s3130_s25 = sld [smem:[#allocation25_spill]]  ;;  %s3131_s21 = smov %s2487_s22 }
 0x671   : > { %s3132_s22 = smov %s2491_s23  ;;  %26 = sbr.rel (!%p24_p10) target bundleno = 14 (0xe), region = 133 }
 0x674   : > { %s3133_s23 = smov %s3128_s18 }
 0x676   :  { %1812 = vsyncpa [#allocation7], 1 }
 0x677   :  { %1814 = vsyncpa [#allocation7 + $0x1], 1 }
 0x678   :  { %1815 = vsyncpa [#allocation10], 1 }
 0x679   :  { %1817 = vsyncpa [#allocation10 + $0x1], 1 }
 0x67a   :  { %1818 = vsyncpa [#allocation13], 1 }
 0x67b   :  { %1819 = vsyncpa [#allocation16], 1 }
 0x67c   :  { %1820 = vsyncpa [#allocation8], 1 }
 0x67d   :  { %1822 = vsyncpa [#allocation8 + $0x1], 1 }

</bundles_post_ra>
